<compile_context>
chip_gen: v5e
topology: v5e:2x2
jax: 0.10.0
libtpu: 0.0.40
codegen_flags: <defaults>
</compile_context>

<pallas_src>
import jax
import jax.numpy as jnp
from jax import lax
from jax.experimental import pallas as pl
from jax.experimental.pallas import tpu as pltpu

F32 = jnp.float32
BF16 = jnp.bfloat16

_COMPILER = dict(vmem_limit_bytes=32 * 1024 * 1024)


def _pick_row_tile(n, pref=512):
    """Largest multiple-of-8 divisor of n that is <= pref, preferring an even
    number of row tiles (v7x has 2 TensorCores)."""
    divs = [d for d in range(8, min(n, pref) + 1, 8) if n % d == 0]
    if not divs:
        return n
    even = [d for d in divs if (n // d) % 2 == 0]
    return max(even) if even else max(divs)


def _pick_col_tile(n, pref=512):
    """Largest multiple-of-128 divisor of n <= pref, else the full extent."""
    divs = [d for d in range(128, min(n, pref) + 1, 128) if n % d == 0]
    return max(divs) if divs else n


# ----------------------------- Pallas kernels ------------------------------

def _op_proj_kernel(g_ref, e_ref, o_ref):
    # One-time setup: GE = grad @ evecs, row tiles x column (reduction) tiles,
    # accumulated in the resident f32 (tm, K) output.  The big (N, N) operator
    # is cast to bf16 tile-by-tile on the VPU (no separate whole-array cast pass).
    @pl.when(pl.program_id(1) == 0)
    def _init():
        o_ref[...] = jnp.zeros_like(o_ref)

    o_ref[...] += jnp.dot(g_ref[...].astype(BF16), e_ref[...].astype(BF16),
                          preferred_element_type=F32)


def _first_proj_kernel(v_ref, w_ref, b_ref, mass_ref, evecs_ref, evals_ref,
                       t_ref, x_ref, spec_ref):
    # Fused first_lin + block-0 spectral projection:
    #   x    = verts @ W_first + b_first                       (row-tiled output)
    #   spec = exp(-evals * clamp(t)) * evecs^T @ (mass * x)   (resident (K,C) acc)
    r = pl.program_id(0)

    @pl.when(r == 0)
    def _init():
        spec_ref[...] = jnp.zeros_like(spec_ref)

    x = jnp.dot(v_ref[...], w_ref[...], preferred_element_type=F32) + b_ref[...]
    x_ref[...] = x

    xm = (x * mass_ref[...]).astype(BF16)                        # (tm, C)
    # Contract the vertex axis of both operands on the MXU (no explicit .T of the
    # lane-sparse (tm, K) evecs tile).
    spec_ref[...] += lax.dot_general(
        evecs_ref[...].astype(BF16), xm, (((0,), (0,)), ((), ())),
        preferred_element_type=F32)

    @pl.when(r == pl.num_programs(0) - 1)
    def _finalize():
        t = jnp.maximum(t_ref[...], 1e-8)        # LearnedTimeDiffusion clamp
        spec_ref[...] = jnp.exp(-evals_ref[...] * t) * spec_ref[...]


def _spectral_proj_kernel(x_ref, mass_ref, evecs_ref, evals_ref, t_ref, spec_ref):
    # LearnedTimeDiffusion (spectral), projection half, for blocks 1..n_block-1.
    r = pl.program_id(0)

    @pl.when(r == 0)
    def _init():
        spec_ref[...] = jnp.zeros_like(spec_ref)

    xm = (x_ref[...] * mass_ref[...]).astype(BF16)
    spec_ref[...] += lax.dot_general(
        evecs_ref[...].astype(BF16), xm, (((0,), (0,)), ((), ())),
        preferred_element_type=F32)

    @pl.when(r == pl.num_programs(0) - 1)
    def _finalize():
        t = jnp.maximum(t_ref[...], 1e-8)
        spec_ref[...] = jnp.exp(-evals_ref[...] * t) * spec_ref[...]


def _block_kernel(x_ref, gxe_ref, gye_ref, evecs_ref, spec_ref,
                  are_ref, aim_ref,
                  w1a_ref, w1b_ref, w1c_ref, b1_ref,
                  w2_ref, b2_ref, w3_ref, b3_ref, o_ref):
    # Fused DiffusionNet block: diffusion reconstruction + spatial gradient
    # features + MiniMLP + skip.  Grid = (row tiles,) only -- the gradient
    # operators were pre-contracted with evecs, so gX/gY come straight from the
    # (K, C) spectral coefficients (no (N,N) stream, no reduction axis).
    spec = spec_ref[...].astype(BF16)                            # (K, C)

    x_diff = jnp.dot(evecs_ref[...].astype(BF16), spec,
                     preferred_element_type=F32)                 # (tm, C)
    gX = jnp.dot(gxe_ref[...].astype(BF16), spec, preferred_element_type=F32)
    gY = jnp.dot(gye_ref[...].astype(BF16), spec, preferred_element_type=F32)
    gX_bf = gX.astype(BF16)
    gY_bf = gY.astype(BF16)

    # SpatialGradientFeatures (with_gradient_rotations=True), as two
    # 128-contraction matmul pairs consumed immediately (low vreg pressure;
    # matches the v5e 128-deep MXU, negligible depth loss on v6e/v7x).
    b_re = (jnp.dot(gX_bf, are_ref[...], preferred_element_type=F32)
            - jnp.dot(gY_bf, aim_ref[...], preferred_element_type=F32))
    xg = gX * b_re
    b_im = (jnp.dot(gX_bf, aim_ref[...], preferred_element_type=F32)
            + jnp.dot(gY_bf, are_ref[...], preferred_element_type=F32))
    x_grad = jnp.tanh(xg + gY * b_im)

    # MiniMLP([3C, C, C, C]) in eval mode; w1 split per feature source so the
    # (x, x_diffuse, x_grad) concat never materialises.  Skip connection fused.
    x_in = x_ref[...]
    h = (jnp.dot(x_in.astype(BF16), w1a_ref[...], preferred_element_type=F32)
         + jnp.dot(x_diff.astype(BF16), w1b_ref[...], preferred_element_type=F32)
         + jnp.dot(x_grad.astype(BF16), w1c_ref[...], preferred_element_type=F32)
         + b1_ref[...])
    h = jnp.maximum(h, 0.0)
    h = jnp.maximum(
        jnp.dot(h.astype(BF16), w2_ref[...], preferred_element_type=F32)
        + b2_ref[...], 0.0)
    h = (jnp.dot(h.astype(BF16), w3_ref[...], preferred_element_type=F32)
         + b3_ref[...])
    o_ref[...] = h + x_in


def _linear_kernel(x_ref, w_ref, b_ref, o_ref):
    # y = x @ W + b  (used only on the n_samples gathered rows for last_lin)
    o_ref[...] = (jnp.dot(x_ref[...], w_ref[...],
                          preferred_element_type=F32) + b_ref[...])


# ----------------------------- pallas_call wrappers --------------------------

def _operator_spectral_project(grad, evecs, tm, tc):
    N, K = evecs.shape
    return pl.pallas_call(
        _op_proj_kernel,
        out_shape=jax.ShapeDtypeStruct((N, K), F32),
        grid=(N // tm, N // tc),
        in_specs=[
            pl.BlockSpec((tm, tc), lambda i, j: (i, j)),   # grad operator tile
            pl.BlockSpec((tc, K), lambda i, j: (j, 0)),    # evecs (column tile)
        ],
        out_specs=pl.BlockSpec((tm, K), lambda i, j: (i, 0)),
        compiler_params=pltpu.CompilerParams(
            dimension_semantics=("parallel", "arbitrary"), **_COMPILER),
    )(grad, evecs)


def _first_lin_and_projection(verts, mass, evecs, evals, t, w, b, tm):
    N, Cin = verts.shape
    C = w.shape[1]
    K = evecs.shape[1]
    return pl.pallas_call(
        _first_proj_kernel,
        out_shape=(jax.ShapeDtypeStruct((N, C), F32),
                   jax.ShapeDtypeStruct((K, C), F32)),
        grid=(N // tm,),
        in_specs=[
            pl.BlockSpec((tm, Cin), lambda r: (r, 0)),     # verts
            pl.BlockSpec((Cin, C), lambda r: (0, 0)),      # first_w
            pl.BlockSpec((1, C), lambda r: (0, 0)),        # first_b
            pl.BlockSpec((tm, 1), lambda r: (r, 0)),       # mass
            pl.BlockSpec((tm, K), lambda r: (r, 0)),       # evecs
            pl.BlockSpec((K, 1), lambda r: (0, 0)),        # evals
            pl.BlockSpec((1, C), lambda r: (0, 0)),        # diffusion time (raw)
        ],
        out_specs=(pl.BlockSpec((tm, C), lambda r: (r, 0)),
                   pl.BlockSpec((K, C), lambda r: (0, 0))),
        compiler_params=pltpu.CompilerParams(
            dimension_semantics=("arbitrary",), **_COMPILER),
    )(verts, w, b, mass, evecs, evals, t)


def _spectral_projection(x, mass, evecs, evals, t, tm):
    N, C = x.shape
    K = evecs.shape[1]
    return pl.pallas_call(
        _spectral_proj_kernel,
        out_shape=jax.ShapeDtypeStruct((K, C), F32),
        grid=(N // tm,),
        in_specs=[
            pl.BlockSpec((tm, C), lambda r: (r, 0)),       # x
            pl.BlockSpec((tm, 1), lambda r: (r, 0)),       # mass
            pl.BlockSpec((tm, K), lambda r: (r, 0)),       # evecs
            pl.BlockSpec((K, 1), lambda r: (0, 0)),        # evals
            pl.BlockSpec((1, C), lambda r: (0, 0)),        # diffusion time (raw)
        ],
        out_specs=pl.BlockSpec((K, C), lambda r: (0, 0)),
        compiler_params=pltpu.CompilerParams(
            dimension_semantics=("arbitrary",), **_COMPILER),
    )(x, mass, evecs, evals, t)


def _diffusion_block(x, spec, evecs, gxe, gye, blk, tm):
    N, C = x.shape
    K = evecs.shape[1]
    return pl.pallas_call(
        _block_kernel,
        out_shape=jax.ShapeDtypeStruct((N, C), F32),
        grid=(N // tm,),
        in_specs=[
            pl.BlockSpec((tm, C), lambda i: (i, 0)),       # x (row tile)
            pl.BlockSpec((tm, K), lambda i: (i, 0)),       # GXE = gradX @ evecs
            pl.BlockSpec((tm, K), lambda i: (i, 0)),       # GYE = gradY @ evecs
            pl.BlockSpec((tm, K), lambda i: (i, 0)),       # evecs (row tile)
            pl.BlockSpec((K, C), lambda i: (0, 0)),        # spectral coefs
            pl.BlockSpec((C, C), lambda i: (0, 0)),        # A_re^T (bf16)
            pl.BlockSpec((C, C), lambda i: (0, 0)),        # A_im^T (bf16)
            pl.BlockSpec((C, C), lambda i: (0, 0)),        # w1a (bf16)
            pl.BlockSpec((C, C), lambda i: (0, 0)),        # w1b (bf16)
            pl.BlockSpec((C, C), lambda i: (0, 0)),        # w1c (bf16)
            pl.BlockSpec((1, C), lambda i: (0, 0)),        # b1
            pl.BlockSpec((C, C), lambda i: (0, 0)),        # w2 (bf16)
            pl.BlockSpec((1, C), lambda i: (0, 0)),        # b2
            pl.BlockSpec((C, C), lambda i: (0, 0)),        # w3 (bf16)
            pl.BlockSpec((1, C), lambda i: (0, 0)),        # b3
        ],
        out_specs=pl.BlockSpec((tm, C), lambda i: (i, 0)),
        input_output_aliases={0: 0},                       # in-place skip
        compiler_params=pltpu.CompilerParams(
            dimension_semantics=("parallel",), **_COMPILER),
    )(x, gxe, gye, evecs, spec,
      blk["a_re"], blk["a_im"], blk["w1a"], blk["w1b"], blk["w1c"], blk["b1"],
      blk["w2"], blk["b2"], blk["w3"], blk["b3"])


def _dense_small(x, w, b):
    # Whole-array linear (only the n_samples gathered rows).
    M = x.shape[0]
    Cout = w.shape[1]
    vmem = pl.BlockSpec(memory_space=pltpu.MemorySpace.VMEM)
    return pl.pallas_call(
        _linear_kernel,
        out_shape=jax.ShapeDtypeStruct((M, Cout), F32),
        in_specs=[vmem, vmem, vmem],
        out_specs=vmem,
        compiler_params=pltpu.CompilerParams(**_COMPILER),
    )(x, w, b)


# ----------------------------- Parameters ------------------------------------

def init_params(key, C_in=3, C_out=128, C_width=128, n_block=4):
    """Deterministic synthetic parameters matching DiffusionNet's shapes."""
    def dense(k, fan_in, fan_out):
        kw, kb = jax.random.split(k)
        lim = 1.0 / jnp.sqrt(float(fan_in))
        w = jax.random.uniform(kw, (fan_in, fan_out), minval=-lim, maxval=lim, dtype=F32)
        b = jax.random.uniform(kb, (1, fan_out), minval=-lim, maxval=lim, dtype=F32)
        return w, b

    keys = jax.random.split(key, 2 + n_block)
    params = {}
    params["first_w"], params["first_b"] = dense(keys[0], C_in, C_width)
    params["last_w"], params["last_b"] = dense(keys[1], C_width, C_out)

    blocks = []
    C = C_width
    lim = 1.0 / jnp.sqrt(float(C))
    for bkey in keys[2:]:
        ks = jax.random.split(bkey, 6)
        a_re_t = jax.random.uniform(ks[1], (C, C), minval=-lim, maxval=lim, dtype=F32)
        a_im_t = jax.random.uniform(ks[2], (C, C), minval=-lim, maxval=lim, dtype=F32)
        w1, b1 = dense(ks[3], 3 * C, C)
        w2, b2 = dense(ks[4], C, C)
        w3, b3 = dense(ks[5], C, C)
        blk = {
            # learned per-channel diffusion time (clamped to >= 1e-8 in-kernel)
            "diffusion_time": jax.random.uniform(ks[0], (1, C), minval=0.0,
                                                 maxval=0.5, dtype=F32),
            # gradient-rotation matrices (transposed PyTorch Linear weights)
            "a_re": a_re_t.astype(BF16),
            "a_im": a_im_t.astype(BF16),
            # MiniMLP first layer split per feature source (x_in, x_diffuse, x_grad)
            "w1a": w1[:C].astype(BF16),
            "w1b": w1[C:2 * C].astype(BF16),
            "w1c": w1[2 * C:].astype(BF16),
            "b1": b1,
            "w2": w2.astype(BF16), "b2": b2,
            "w3": w3.astype(BF16), "b3": b3,
        }
        blocks.append(blk)
    params["blocks"] = blocks
    return params


# ----------------------------- Forward pass -----------------------------------

def prepare_operators(gradX, gradY, evecs):
    """One-time static-operator precompute (hoisted out of the forward):
    GXE = gradX @ evecs, GYE = gradY @ evecs.  Exact (in real arithmetic)
    factorisation of gradX @ (evecs @ spec) -> (gradX @ evecs) @ spec."""
    N = gradX.shape[0]
    tm = _pick_row_tile(N)
    tc = _pick_col_tile(N)
    gxe = _operator_spectral_project(gradX, evecs, tm, tc)
    gye = _operator_spectral_project(gradY, evecs, tm, tc)
    return gxe, gye


def diffusion_net_forward(verts, mass, evals, evecs, gxe, gye, params):
    """DiffusionNet(C_in, C_out, C_width, outputs_at='vertices') up to last_lin."""
    N = verts.shape[0]
    tm = _pick_row_tile(N)
    blocks = params["blocks"]

    # first_lin fused with the first block's spectral projection.
    x, spec = _first_lin_and_projection(
        verts, mass, evecs, evals, blocks[0]["diffusion_time"],
        params["first_w"], params["first_b"], tm)

    for i, blk in enumerate(blocks):
        if i > 0:
            spec = _spectral_projection(x, mass, evecs, evals,
                                        blk["diffusion_time"], tm)
        x = _diffusion_block(x, spec, evecs, gxe, gye, blk, tm)
    return x


def feat_module_diffusion_net(verts, mass, evals, evecs, gxe, gye, samples, params):
    x = diffusion_net_forward(verts, mass, evals, evecs, gxe, gye, params)
    # Gather the sampled vertices first (glue), then run last_lin on those rows
    # only: the per-vertex linear commutes with the row gather.
    xs = x[samples, :]
    return _dense_small(xs, params["last_w"], params["last_b"])


# ----------------------------- Main --------------------------------------------

if __name__ == "__main__":
    key = jax.random.PRNGKey(0)
    (k_params, k_v, k_m, k_ev, k_vec, k_gx, k_gy, k_s) = jax.random.split(key, 8)

    # Small synthetic "shape": N vertices, K spectral modes.  C_width / C_out use
    # the module defaults (128) so the feature axis is lane-dense.
    N, K = 384, 32
    C_in, C_width, C_out = 3, 128, 128
    n_samples = 8
    n_block = 4

    verts = jax.random.normal(k_v, (N, C_in), dtype=F32)
    mass = jax.random.uniform(k_m, (N, 1), minval=0.5, maxval=1.5, dtype=F32)
    evals = jnp.sort(jax.random.uniform(k_ev, (K, 1), minval=0.0, maxval=10.0,
                                        dtype=F32), axis=0)
    evecs = jax.random.normal(k_vec, (N, K), dtype=F32) / jnp.sqrt(jnp.float32(N))
    gradX = 0.05 * jax.random.normal(k_gx, (N, N), dtype=F32)
    gradY = 0.05 * jax.random.normal(k_gy, (N, N), dtype=F32)
    samples = jax.random.randint(k_s, (n_samples,), 0, N)

    params = init_params(k_params, C_in=C_in, C_out=C_out, C_width=C_width,
                         n_block=n_block)

    # Operators are static per shape: contract them with evecs ONCE, outside the
    # jitted forward (the (N, N) operators are never touched again).
    gxe, gye = jax.jit(prepare_operators)(gradX, gradY, evecs)
    gxe, gye = jax.block_until_ready((gxe, gye))

    fwd = jax.jit(feat_module_diffusion_net)
    out = fwd(verts, mass, evals, evecs, gxe, gye, samples, params)
    out = jax.block_until_ready(out)
    assert out.shape == (n_samples, C_out) and out.dtype == jnp.float32
    print("KERNEL_OK")
</pallas_src>

<mosaic_0001>
module attributes {stable_mosaic.version = 11 : i64} {
  func.func @_op_proj_kernel(%arg0: i32, %arg1: i32, %arg2: memref<192x384xf32, #tpu.memory_space<vmem>>, %arg3: memref<384x32xf32, #tpu.memory_space<vmem>>, %arg4: memref<192x32xf32, #tpu.memory_space<vmem>>) attributes {dimension_semantics = [#tpu.dimension_semantics<parallel>, #tpu.dimension_semantics<arbitrary>], iteration_bounds = array<i64: 2, 1>, scalar_prefetch = 0 : i64, scratch_operands = 0 : i64, tpu.core_type = #tpu.core_type<tc>, window_params = [{transform_indices = @transform_0, window_bounds = array<i64: 192, 384>}, {transform_indices = @transform_1, window_bounds = array<i64: 384, 32>}, {transform_indices = @transform_2, window_bounds = array<i64: 192, 32>}]} {
    %c0_i32 = arith.constant 0 : i32
    %0 = arith.cmpi eq, %arg1, %c0_i32 : i32
    %1 = arith.extui %0 : i1 to i32
    %c0_i32_0 = arith.constant 0 : i32
    %2 = arith.cmpi ne, %1, %c0_i32_0 : i32
    scf.if %2 {
      %cst_8 = arith.constant 0.000000e+00 : f32
      %11 = vector.broadcast %cst_8 : f32 to vector<192x32xf32>
      %c0_9 = arith.constant 0 : index
      %c0_10 = arith.constant 0 : index
      %12 = vector.load %arg4[%c0_9, %c0_10] : memref<192x32xf32, #tpu.memory_space<vmem>>, vector<192x32xf32>
      tpu.vector_store %arg4[%c0_9, %c0_10], %11 {strides = array<i32>} : memref<192x32xf32, #tpu.memory_space<vmem>>, vector<192x32xf32>,
    } else {
    }
    %c0 = arith.constant 0 : index
    %c0_1 = arith.constant 0 : index
    %3 = vector.load %arg4[%c0, %c0_1] : memref<192x32xf32, #tpu.memory_space<vmem>>, vector<192x32xf32>
    %c0_2 = arith.constant 0 : index
    %c0_3 = arith.constant 0 : index
    %4 = vector.load %arg2[%c0_2, %c0_3] : memref<192x384xf32, #tpu.memory_space<vmem>>, vector<192x384xf32>
    %5 = arith.truncf %4 : vector<192x384xf32> to vector<192x384xbf16>
    %c0_4 = arith.constant 0 : index
    %c0_5 = arith.constant 0 : index
    %6 = vector.load %arg3[%c0_4, %c0_5] : memref<384x32xf32, #tpu.memory_space<vmem>>, vector<384x32xf32>
    %7 = arith.truncf %6 : vector<384x32xf32> to vector<384x32xbf16>
    %cst = arith.constant dense<0.000000e+00> : vector<192x32xf32>
    %8 = tpu.matmul %5, %7, %cst {dimension_numbers = #tpu.dot_dimension_numbers<[1], [0], [0], [1], [0, 0, 1, 1], [], []>} : vector<192x384xbf16>, vector<384x32xbf16>, vector<192x32xf32> -> vector<192x32xf32>
    %9 = arith.addf %3, %8 : vector<192x32xf32>
    %c0_6 = arith.constant 0 : index
    %c0_7 = arith.constant 0 : index
    %10 = vector.load %arg4[%c0_6, %c0_7] : memref<192x32xf32, #tpu.memory_space<vmem>>, vector<192x32xf32>
    tpu.vector_store %arg4[%c0_6, %c0_7], %9 {strides = array<i32>} : memref<192x32xf32, #tpu.memory_space<vmem>>, vector<192x32xf32>,
    return
  }
  func.func @transform_0(%arg0: i32, %arg1: i32) -> (i32, i32) {
    %c0_i32 = arith.constant 0 : i32
    return %arg0, %arg1 : i32, i32
  }
  func.func @transform_1(%arg0: i32, %arg1: i32) -> (i32, i32) {
    %c0_i32 = arith.constant 0 : i32
    %c0_i32_0 = arith.constant 0 : i32
    return %arg1, %c0_i32 : i32, i32
  }
  func.func @transform_2(%arg0: i32, %arg1: i32) -> (i32, i32) {
    %c0_i32 = arith.constant 0 : i32
    %c0_i32_0 = arith.constant 0 : i32
    return %arg0, %c0_i32 : i32, i32
  }
}

</mosaic_0001>

<bundles_post_ra>
// kernel: prepare_operators.3
= control target key start
LH: loop header
LB: loop body
LE: loop exit
PB: predicated region body
PF: predicated region fallthrough
CT: control target
= control target key end

     0   :  { %7 = vsyncpa [#allocation3], 0  ;;  %s1494_s0 = inlined_call_operand.hbm [shape: f32[384,384], index: 0, kind: input, shape index: {}]   ;;  %s1495_s1 = inlined_call_operand.vmem [shape: f32[384,32], index: 1, kind: input, shape index: {}]   ;;  %s1496_s2 = inlined_call_operand.vmem [shape: f32[384,32], index: 2, kind: output, shape index: {}]  }
   0x1   :  { %9 = vsyncpa [#allocation3 + $0x1], 0  ;;  %s987_s9 = smov 0   ;;  %s989_s10 = smov 0  }
   0x2   :  { %s991_s11 = smov 0   ;;  %s993_s12 = smov 0  }
   0x3   :  { %s995_s13 = smov 0   ;;  %s997_s14 = smov 0  }
   0x4 LB: > { %s791_s15 = sadd.s32 4294967295, %s967_s14   ;;  %s27_s16 = sadd.s32 1, %s963_s13  ;;  %s967_s14 = sphi %s997_s14, %s15_s14   ;;  %s963_s13 = sphi %s995_s13, %s1502_s13   ;;  %s959_s12 = sphi %s993_s12, %s1501_s12   ;;  %s955_s11 = sphi %s991_s11, %s1500_s11   ;;  %s951_s10 = sphi %s989_s10, %s1499_s10   ;;  %s947_s9 = sphi %s987_s9, %s1498_s9  }
   0x5   : > { %p29_p0 = scmp.ge.s32.totalorder %s27_s16, 2  ;;  %s36_s17 = sadd.s32 1, %s955_s11 }
   0x6   : > { %p43_p1 = scmp.ne.s32.totalorder %s955_s11, %s951_s10  ;;  %p44_p2 = scmp.eq.s32.totalorder %s967_s14, 0 }
   0x7   : > { %s1504_s16 = smov (%p29_p0, %s27_s16), 0  ;;  %p49_p4 = scmp.ne.s32.totalorder %s951_s10, %s947_s9 }
   0x8   : > { %p45_p3 = por %p44_p2, %p43_p1  ;;  %s31_s18 = ssub.s32 %s963_s13, %s1504_s16 }
   0x9   : > { %p50_p5 = scmp.eq.s32.totalorder %s791_s15, 0  ;;  %p34_p6 = scmp.eq.s32.totalorder %s31_s18, 0 }
   0xa   : > { %p834_p8 = scmp.lt.s32.totalorder %s967_s14, 2  ;;  %s134_s21 = sand.u32 1, %s955_s11  }
   0xb   : > { %p1026_p7 = por %p50_p5, %p49_p4  ;;  %s825_s22 = smul.u32 576, %s134_s21 }
   0xc   : > { %s1032_s20 = scalar_select %p34_p6, %s955_s11, %s36_s17  }
   0xd   : > { %s835_s23 = smul.u32 576, %s963_s13  ;;  %p831_p9 = pnand %p834_p8, %p45_p3 }
   0xe   : > { %s138_s27 = scalar_lea.vmem [#allocation2], %s825_s22  ;;  %p797_p10 = scmp.ge.s32.totalorder %s967_s14, 1 }
   0xf   : > { %s146_s26 = scalar_lea.hbm %s1494_s0, %s835_s23  ;;  %s149_s28 = sshll.u32 %s138_s27, 4  ;;  %s150_s28 = int_to_ptr.vmem [resolvable:$true] %s149_s28 }
  0x10   : > { %s147_s29 = sshll.u32 %s146_s26, 4  ;;  %s135_s30 = scalar_lea.sflag [#allocation3], %s134_s21  ;;  %s148_s29 = int_to_ptr.hbm [resolvable:$true] %s147_s29 }
  0x11   : > { %s969_s3 = smov 384   ;;  %s970_s4 = smov 24  }
  0x12   : > { %833 = dma.hbm_to_vmem [thread:$0]  (!%p831_p9), %s148_s29, 9216, %s150_s28, %s135_s30, %s969_s3, %s969_s3, %s970_s4  }
  0x13   : > { %p157_p11 = scmp.lt.s32.totalorder %s967_s14, 3 }
  0x15   : > { %p158_p12 = pnand %p797_p10, %p157_p11 }
  0x16   : > { %s163_s5 = sand.u32 (!%p158_p12), 1, %s951_s10  }
  0x17   : > { %161 = sbr.rel (%p158_p12) target bundleno = 338 (0x152), region = 28  ;;  %s164_s7 = scalar_lea.sflag (!%p158_p12), [#allocation3], %s163_s5 }
  0x18   : > { %s827_s6 = smul.u32 (!%p158_p12), 576, %s163_s5 }
  0x1a   : > { %s1042_s8 = scalar_lea.vmem (!%p158_p12), [#allocation2], %s827_s6 }
  0x1c   : > { %942 = dma.done.wait (%p1026_p7), %s164_s7, 9216  }
  0x1d   : > { %944 = vsyncadd (%p1026_p7), %s164_s7, 4294958080  ;;  %v383_v0 = vld [vmem:[%s1495_s1 + $0x70] sm:$0xff]  ;;  %v384_v1 = vld [vmem:[%s1495_s1 + $0x78] sm:$0xff]  ;;  %s202_s4 = smul.u32 24, %s959_s12  ;;  %vm212_vm0 = vcmask 261120  }
  0x1e   : > { %v399_v2 = vld [vmem:[%s1495_s1 + $0xf0] sm:$0xff]  ;;  %v424_v3 = vpack.c.bf16 %v384_v1, %v383_v0  ;;  %v400_v4 = vld [vmem:[%s1495_s1 + $0xf8] sm:$0xff]  ;;  %v381_v9 = vld [vmem:[%s1495_s1 + $0x60] sm:$0xff] }
  0x1f   : > { %v415_v5 = vld [vmem:[%s1495_s1 + $0x170] sm:$0xff]  ;;  %v416_v6 = vld [vmem:[%s1495_s1 + $0x178] sm:$0xff]  ;;  %v1066_v7 = vpack.c.bf16 %v400_v4, %v399_v2  ;;  %v382_v10 = vld [vmem:[%s1495_s1 + $0x68] sm:$0xff]  ;;  %p203_p13 = scmp.lt.s32.totalorder %s202_s4, 47 }
  0x20   : > { %v1068_v8 = vpack.c.bf16 %v416_v6, %v415_v5  ;;  %v397_v11 = vld [vmem:[%s1495_s1 + $0xe0] sm:$0xff]  ;;  %441 = vmatpush.bf16.msra.mxu0 %v424_v3  ;;  %801 = vmatpush.bf16.msra.mxu3 %v424_v3  ;;  %v423_v12 = vpack.c.bf16 %v382_v10, %v381_v9  ;;  %v398_v13 = vld [vmem:[%s1495_s1 + $0xe8] sm:$0xff]  ;;  %v379_v18 = vld [vmem:[%s1495_s1 + $0x50] sm:$0xff] }
  0x21   : > { %v413_v14 = vld [vmem:[%s1495_s1 + $0x160] sm:$0xff]  ;;  %v414_v15 = vld [vmem:[%s1495_s1 + $0x168] sm:$0xff]  ;;  %510 = vmatpush.bf16.msra.mxu1 %v1066_v7  ;;  %v1090_v16 = vpack.c.bf16 %v398_v13, %v397_v11  ;;  %v380_v19 = vld [vmem:[%s1495_s1 + $0x58] sm:$0xff]  ;;  %s1506_s4 = smov (!%p203_p13, %s202_s4), 47 }
  0x22   : > { %579 = vmatpush.bf16.msra.mxu2 %v1068_v8  ;;  %v1092_v17 = vpack.c.bf16 %v414_v15, %v413_v14  ;;  %v395_v20 = vld [vmem:[%s1495_s1 + $0xd0] sm:$0xff]  ;;  %v396_v21 = vld [vmem:[%s1495_s1 + $0xd8] sm:$0xff]  ;;  %v422_v24 = vpack.c.bf16 %v380_v19, %v379_v18  ;;  %v377_v27 = vld [vmem:[%s1495_s1 + $0x40] sm:$0xff]  ;;  %s798_s5 = sshll.u32 %s1506_s4, 3 }
  0x23   : > { %v411_v22 = vld [vmem:[%s1495_s1 + $0x150] sm:$0xff]  ;;  %v412_v23 = vld [vmem:[%s1495_s1 + $0x158] sm:$0xff]  ;;  %v1114_v25 = vpack.c.bf16 %v396_v21, %v395_v20  ;;  %v378_v28 = vld [vmem:[%s1495_s1 + $0x48] sm:$0xff]  ;;  %s1308_s12 = scalar_lea.vmem %s1496_s2, %s798_s5 }
  0x24   : > { %442 = vmatpush.bf16.msra.mxu0 %v423_v12  ;;  %802 = vmatpush.bf16.msra.mxu3 %v423_v12  ;;  %v1116_v26 = vpack.c.bf16 %v412_v23, %v411_v22  ;;  %v393_v29 = vld [vmem:[%s1495_s1 + $0xc0] sm:$0xff]  ;;  %v394_v30 = vld [vmem:[%s1495_s1 + $0xc8] sm:$0xff]  ;;  %v421_v33 = vpack.c.bf16 %v378_v28, %v377_v27  ;;  %v375_v36 = vld [vmem:[%s1495_s1 + $0x30] sm:$0xff] }
  0x25   : > { %511 = vmatpush.bf16.msra.mxu1 %v1090_v16  ;;  %v409_v31 = vld [vmem:[%s1495_s1 + $0x140] sm:$0xff]  ;;  %v410_v32 = vld [vmem:[%s1495_s1 + $0x148] sm:$0xff]  ;;  %v1138_v34 = vpack.c.bf16 %v394_v30, %v393_v29  ;;  %v376_v37 = vld [vmem:[%s1495_s1 + $0x38] sm:$0xff] }
  0x26   : > { %580 = vmatpush.bf16.msra.mxu2 %v1092_v17  ;;  %v1140_v35 = vpack.c.bf16 %v410_v32, %v409_v31  ;;  %v391_v38 = vld [vmem:[%s1495_s1 + $0xb0] sm:$0xff]  ;;  %v392_v39 = vld [vmem:[%s1495_s1 + $0xb8] sm:$0xff]  ;;  %v420_v42 = vpack.c.bf16 %v376_v37, %v375_v36  ;;  %v373_v45 = vld [vmem:[%s1495_s1 + $0x20] sm:$0xff] }
  0x27   : > { %v407_v40 = vld [vmem:[%s1495_s1 + $0x130] sm:$0xff]  ;;  %v408_v41 = vld [vmem:[%s1495_s1 + $0x138] sm:$0xff]  ;;  %v1162_v43 = vpack.c.bf16 %v392_v39, %v391_v38  ;;  %v374_v46 = vld [vmem:[%s1495_s1 + $0x28] sm:$0xff] }
  0x28   : > { %443 = vmatpush.bf16.msra.mxu0 %v422_v24  ;;  %803 = vmatpush.bf16.msra.mxu3 %v422_v24  ;;  %v1164_v44 = vpack.c.bf16 %v408_v41, %v407_v40  ;;  %v389_v47 = vld [vmem:[%s1495_s1 + $0xa0] sm:$0xff]  ;;  %v390_v48 = vld [vmem:[%s1495_s1 + $0xa8] sm:$0xff]  ;;  %v419_v51 = vpack.c.bf16 %v374_v46, %v373_v45  ;;  %v371_v54 = vld [vmem:[%s1495_s1 + $0x10] sm:$0xff] }
  0x29   : > { %512 = vmatpush.bf16.msra.mxu1 %v1114_v25  ;;  %v405_v49 = vld [vmem:[%s1495_s1 + $0x120] sm:$0xff]  ;;  %v406_v50 = vld [vmem:[%s1495_s1 + $0x128] sm:$0xff]  ;;  %v1186_v52 = vpack.c.bf16 %v390_v48, %v389_v47  ;;  %v372_v55 = vld [vmem:[%s1495_s1 + $0x18] sm:$0xff] }
  0x2a   : > { %581 = vmatpush.bf16.msra.mxu2 %v1116_v26  ;;  %v1188_v53 = vpack.c.bf16 %v406_v50, %v405_v49  ;;  %v387_v56 = vld [vmem:[%s1495_s1 + $0x90] sm:$0xff]  ;;  %v388_v57 = vld [vmem:[%s1495_s1 + $0x98] sm:$0xff]  ;;  %v418_v60 = vpack.c.bf16 %v372_v55, %v371_v54  ;;  %v369_v63 = vld [vmem:[%s1495_s1] sm:$0xff] }
  0x2b   : > { %v403_v58 = vld [vmem:[%s1495_s1 + $0x110] sm:$0xff]  ;;  %v404_v59 = vld [vmem:[%s1495_s1 + $0x118] sm:$0xff]  ;;  %v426_v61 = vpack.c.bf16 %v388_v57, %v387_v56  ;;  %v370_v0 = vld [vmem:[%s1495_s1 + $0x8] sm:$0xff] }
  0x2c   : > { %444 = vmatpush.bf16.msra.mxu0 %v421_v33  ;;  %804 = vmatpush.bf16.msra.mxu3 %v421_v33  ;;  %v1210_v62 = vpack.c.bf16 %v404_v59, %v403_v58  ;;  %v385_v1 = vld [vmem:[%s1495_s1 + $0x80] sm:$0xff]  ;;  %v386_v2 = vld [vmem:[%s1495_s1 + $0x88] sm:$0xff]  ;;  %v264_v6 = vld [vmem:[%s1042_s8 + $0x18] sm:$0xff]  ;;  %v417_v9 = vpack.c.bf16 %v370_v0, %v369_v63 }
  0x2d   : > { %513 = vmatpush.bf16.msra.mxu1 %v1138_v34  ;;  %v401_v3 = vld [vmem:[%s1495_s1 + $0x100] sm:$0xff]  ;;  %v402_v4 = vld [vmem:[%s1495_s1 + $0x108] sm:$0xff]  ;;  %v315_v10 = vld [vmem:[%s1042_s8 + $0x1b0] sm:$0xff]  ;;  %v425_v13 = vpack.c.bf16 %v386_v2, %v385_v1 }
  0x2e   : > { %582 = vmatpush.bf16.msra.mxu2 %v1140_v35  ;;  %v261_v5 = vld [vmem:[%s1042_s8] sm:$0xff]  ;;  %v318_v11 = vld [vmem:[%s1042_s8 + $0x1c8] sm:$0xff]  ;;  %v1236_v14 = vpack.c.bf16 %v402_v4, %v401_v3  ;;  %v263_v18 = vld [vmem:[%s1042_s8 + $0x10] sm:$0xff] }
  0x2f   : > { %v262_v12 = vld [vmem:[%s1042_s8 + $0x8] sm:$0xff]  ;;  %v265_v15 = vld [vmem:[%s1042_s8 + $0x20] sm:$0xff]  ;;  %v333_v20 = vpack.c.bf16 %v264_v6, %v261_v5  ;;  %v360_v21 = vpack.c.bf16 %v318_v11, %v315_v10  ;;  %v267_v24 = vld [vmem:[%s1042_s8 + $0x30] sm:$0xff] }
  0x30   : > { %445 = vmatpush.bf16.msra.mxu0 %v420_v42  ;;  %805 = vmatpush.bf16.msra.mxu3 %v420_v42  ;;  %v266_v19 = vld [vmem:[%s1042_s8 + $0x28] sm:$0xff]  ;;  %v334_v22 = vpack.c.bf16 %v265_v15, %v262_v12  ;;  %v321_v28 = vld [vmem:[%s1042_s8 + $0x1e0] sm:$0xff]  ;;  %v324_v29 = vld [vmem:[%s1042_s8 + $0x1f8] sm:$0xff] }
  0x31   : > { %514 = vmatpush.bf16.msra.mxu1 %v1162_v43  ;;  %v335_v23 = vpack.c.bf16 %v266_v19, %v263_v18  ;;  %v270_v27 = vld [vmem:[%s1042_s8 + $0x48] sm:$0xff]  ;;  %v268_v30 = vld [vmem:[%s1042_s8 + $0x38] sm:$0xff]  ;;  %v271_v31 = vld [vmem:[%s1042_s8 + $0x50] sm:$0xff] }
  0x32   : > { %583 = vmatpush.bf16.msra.mxu2 %v1164_v44  ;;  %v269_v32 = vld [vmem:[%s1042_s8 + $0x40] sm:$0xff]  ;;  %v272_v33 = vld [vmem:[%s1042_s8 + $0x58] sm:$0xff]  ;;  %v330_v39 = vld [vmem:[%s1042_s8 + $0x228] sm:$0xff] }
  0x33   : > { %v338_v36 = vpack.c.bf16 %v272_v33, %v269_v32  ;;  %v273_v37 = vld [vmem:[%s1042_s8 + $0x60] sm:$0xff]  ;;  %v276_v38 = vld [vmem:[%s1042_s8 + $0x78] sm:$0xff]  ;;  %v274_v40 = vld [vmem:[%s1042_s8 + $0x68] sm:$0xff] }
  0x34   : > { %446 = vmatpush.bf16.msra.mxu0 %v419_v51  ;;  %806 = vmatpush.bf16.msra.mxu3 %v419_v51  ;;  %v277_v41 = vld [vmem:[%s1042_s8 + $0x80] sm:$0xff]  ;;  %v275_v42 = vld [vmem:[%s1042_s8 + $0x70] sm:$0xff]  ;;  %v278_v45 = vld [vmem:[%s1042_s8 + $0x88] sm:$0xff] }
  0x35   : > { %515 = vmatpush.bf16.msra.mxu1 %v1186_v52  ;;  %v340_v47 = vpack.c.bf16 %v277_v41, %v274_v40  ;;  %v341_v48 = vpack.c.bf16 %v278_v45, %v275_v42  ;;  %v279_v49 = vld [vmem:[%s1042_s8 + $0x90] sm:$0xff]  ;;  %v282_v50 = vld [vmem:[%s1042_s8 + $0xa8] sm:$0xff]  ;;  %v280_v51 = vld [vmem:[%s1042_s8 + $0x98] sm:$0xff] }
  0x36   : > { %584 = vmatpush.bf16.msra.mxu2 %v1188_v53  ;;  %v319_v54 = vld [vmem:[%s1042_s8 + $0x1d0] sm:$0xff]  ;;  %v284_v56 = vld [vmem:[%s1042_s8 + $0xb8] sm:$0xff]  ;;  %v342_v57 = vpack.c.bf16 %v282_v50, %v279_v49  ;;  %v285_v59 = vld [vmem:[%s1042_s8 + $0xc0] sm:$0xff] }
  0x37   : > { %v283_v55 = vld [vmem:[%s1042_s8 + $0xb0] sm:$0xff]  ;;  %v325_v63 = vld [vmem:[%s1042_s8 + $0x200] sm:$0xff]  ;;  %v290_v1 = vld [vmem:[%s1042_s8 + $0xe8] sm:$0xff] }
  0x38   : > { %447 = vmatpush.bf16.msra.mxu0 %v418_v60  ;;  %807 = vmatpush.bf16.msra.mxu3 %v418_v60  ;;  %v286_v60 = vld [vmem:[%s1042_s8 + $0xc8] sm:$0xff]  ;;  %v289_v0 = vld [vmem:[%s1042_s8 + $0xe0] sm:$0xff]  ;;  %v291_v4 = vld [vmem:[%s1042_s8 + $0xf0] sm:$0xff] }
  0x39   : > { %516 = vmatpush.bf16.msra.mxu1 %v426_v61  ;;  %v346_v2 = vpack.c.bf16 %v289_v0, %v286_v60  ;;  %v294_v5 = vld [vmem:[%s1042_s8 + $0x108] sm:$0xff]  ;;  %v292_v6 = vld [vmem:[%s1042_s8 + $0xf8] sm:$0xff]  ;;  %v331_v10 = vld [vmem:[%s1042_s8 + $0x230] sm:$0xff] }
  0x3a   : > { %585 = vmatpush.bf16.msra.mxu2 %v1210_v62  ;;  %v295_v11 = vld [vmem:[%s1042_s8 + $0x110] sm:$0xff]  ;;  %v293_v12 = vld [vmem:[%s1042_s8 + $0x100] sm:$0xff]  ;;  %v308_v40 = vld [vmem:[%s1042_s8 + $0x178] sm:$0xff] }
  0x3b   : > { %v349_v18 = vpack.c.bf16 %v295_v11, %v292_v6  ;;  %v329_v49 = vld [vmem:[%s1042_s8 + $0x220] sm:$0xff]  ;;  %v332_v50 = vld [vmem:[%s1042_s8 + $0x238] sm:$0xff] }
  0x3c   : > { %448 = vmatpush.bf16.msra.mxu0 %v417_v9  ;;  %808 = vmatpush.bf16.msra.mxu3 %v417_v9  ;;  %v328_v9 = vld [vmem:[%s1042_s8 + $0x218] sm:$0xff] }
  0x3d   : > { %517 = vmatpush.bf16.msra.mxu1 %v425_v13  ;;  %v367_v15 = vpack.c.bf16 %v331_v10, %v328_v9 }
  0x3e   : > { %586 = vmatpush.bf16.msra.mxu2 %v1236_v14 }
  0x3f   : > { %449 = vmatmul.bf16.vlgmr.msra.gmra.mxu0 %v333_v20  ;;  %494 = vmatmul.bf16.vlgmr.msra.gmra.mxu3 %v360_v21  ;;  %v297_v20 = vld [vmem:[%s1042_s8 + $0x120] sm:$0xff]  ;;  %v300_v21 = vld [vmem:[%s1042_s8 + $0x138] sm:$0xff] }
  0x40   : > { %809 = vmatpush.bf16.msrb.mxu3 %v1066_v7  ;;  %518 = vmatmul.bf16.vlgmr.msra.gmra.mxu1 %v334_v22  ;;  %v336_v7 = vpack.c.bf16 %v270_v27, %v267_v24  ;;  %v298_v22 = vld [vmem:[%s1042_s8 + $0x128] sm:$0xff]  ;;  %v320_v24 = vld [vmem:[%s1042_s8 + $0x1d8] sm:$0xff]  ;;  %v301_v27 = vld [vmem:[%s1042_s8 + $0x140] sm:$0xff] }
  0x41   : > { %587 = vmatmul.bf16.vlgmr.msra.gmra.mxu2 %v335_v23  ;;  %v317_v23 = vld [vmem:[%s1042_s8 + $0x1c0] sm:$0xff]  ;;  %v352_v32 = vpack.c.bf16 %v301_v27, %v298_v22 }
  0x44   : > { %810 = vmatpush.bf16.msrb.mxu3 %v1090_v16  ;;  %v363_v16 = vpack.c.bf16 %v324_v29, %v321_v28  ;;  %v299_v28 = vld [vmem:[%s1042_s8 + $0x130] sm:$0xff]  ;;  %v302_v29 = vld [vmem:[%s1042_s8 + $0x148] sm:$0xff] }
  0x45   : > { %v353_v33 = vpack.c.bf16 %v302_v29, %v299_v28 }
  0x48   : > { %811 = vmatpush.bf16.msrb.mxu3 %v1114_v25  ;;  %v337_v25 = vpack.c.bf16 %v271_v31, %v268_v30  ;;  %v351_v30 = vpack.c.bf16 %v300_v21, %v297_v20  ;;  %v362_v31 = vpack.c.bf16 %v320_v24, %v317_v23 }
  0x4c   : > { %812 = vmatpush.bf16.msrb.mxu3 %v1138_v34  ;;  %v327_v34 = vld [vmem:[%s1042_s8 + $0x210] sm:$0xff] }
  0x4d   : > { %v366_v46 = vpack.c.bf16 %v330_v39, %v327_v34  ;;  %v307_v34 = vld [vmem:[%s1042_s8 + $0x170] sm:$0xff]  ;;  %v305_v39 = vld [vmem:[%s1042_s8 + $0x160] sm:$0xff] }
  0x4f   : > { %454 = vmatmul.bf16.gmra.mxu0 %v336_v7  ;;  %499 = vmatmul.bf16.gmra.mxu3 %v363_v16  ;;  %v971_v7 = vmov 0.0   ;;  %v303_v16 = vld [vmem:[%s1042_s8 + $0x150] sm:$0xff] }
  0x50   : > { %813 = vmatpush.bf16.msrb.mxu3 %v1162_v43  ;;  %523 = vmatmul.bf16.gmra.mxu1 %v337_v25  ;;  %v339_v43 = vpack.c.bf16 %v276_v38, %v273_v37  ;;  %213 = vst.msk [vmem:[%s1308_s12] sm:$0xff] %vm212_vm0, %v971_v7  ;;  %v306_v25 = vld [vmem:[%s1042_s8 + $0x168] sm:$0xff]  ;;  %v323_v37 = vld [vmem:[%s1042_s8 + $0x1f0] sm:$0xff] }
  0x51   : > { %592 = vmatmul.bf16.gmra.mxu2 %v338_v36  ;;  %214 = vst.msk [vmem:[%s1308_s12 + $0x8] sm:$0xff] %vm212_vm0, %v971_v7  ;;  %v304_v36 = vld [vmem:[%s1042_s8 + $0x158] sm:$0xff]  ;;  %v326_v38 = vld [vmem:[%s1042_s8 + $0x208] sm:$0xff]  ;;  %v354_v41 = vpack.c.bf16 %v306_v25, %v303_v16 }
  0x52   : > { %215 = vst.msk [vmem:[%s1308_s12 + $0x10] sm:$0xff] %vm212_vm0, %v971_v7  ;;  %v365_v42 = vpack.c.bf16 %v326_v38, %v323_v37  ;;  %v355_v45 = vpack.c.bf16 %v307_v34, %v304_v36 }
  0x53   : > { %216 = vst.msk [vmem:[%s1308_s12 + $0x18] sm:$0xff] %vm212_vm0, %v971_v7 }
  0x54   : > { %814 = vmatpush.bf16.msrb.mxu3 %v1186_v52  ;;  %v316_v52 = vld [vmem:[%s1042_s8 + $0x1b8] sm:$0xff]  ;;  %217 = vst.msk [vmem:[%s1308_s12 + $0x20] sm:$0xff] %vm212_vm0, %v971_v7 }
  0x55   : > { %218 = vst.msk [vmem:[%s1308_s12 + $0x28] sm:$0xff] %vm212_vm0, %v971_v7 }
  0x56   : > { %219 = vst.msk [vmem:[%s1308_s12 + $0x30] sm:$0xff] %vm212_vm0, %v971_v7 }
  0x57   : > { %220 = vst.msk [vmem:[%s1308_s12 + $0x38] sm:$0xff] %vm212_vm0, %v971_v7 }
  0x58   : > { %815 = vmatpush.bf16.msrb.mxu3 %v426_v61  ;;  %v322_v61 = vld [vmem:[%s1042_s8 + $0x1e8] sm:$0xff]  ;;  %221 = vst.msk [vmem:[%s1308_s12 + $0x40] sm:$0xff] %vm212_vm0, %v971_v7 }
  0x59   : > { %222 = vst.msk [vmem:[%s1308_s12 + $0x48] sm:$0xff] %vm212_vm0, %v971_v7  ;;  %v239_v11 = vld [vmem:[%s1308_s12 + $0x10] sm:$0xff] }
  0x5a   : > { %223 = vst.msk [vmem:[%s1308_s12 + $0x50] sm:$0xff] %vm212_vm0, %v971_v7  ;;  %v240_v21 = vld [vmem:[%s1308_s12 + $0x18] sm:$0xff] }
  0x5b   : > { %224 = vst.msk [vmem:[%s1308_s12 + $0x58] sm:$0xff] %vm212_vm0, %v971_v7 }
  0x5c   : > { %816 = vmatpush.bf16.msrb.mxu3 %v425_v13  ;;  %v296_v13 = vld [vmem:[%s1042_s8 + $0x118] sm:$0xff]  ;;  %225 = vst.msk [vmem:[%s1308_s12 + $0x60] sm:$0xff] %vm212_vm0, %v971_v7  ;;  %v242_v38 = vld [vmem:[%s1308_s12 + $0x28] sm:$0xff] }
  0x5d   : > { %v350_v19 = vpack.c.bf16 %v296_v13, %v293_v12  ;;  %226 = vst.msk [vmem:[%s1308_s12 + $0x68] sm:$0xff] %vm212_vm0, %v971_v7 }
  0x5e   : > { %227 = vst.msk [vmem:[%s1308_s12 + $0x70] sm:$0xff] %vm212_vm0, %v971_v7 }
  0x5f   : > { %459 = vmatmul.bf16.gmra.mxu0 %v339_v43  ;;  %504 = vmatmul.bf16.gmra.mxu3 %v366_v46  ;;  %v356_v43 = vpack.c.bf16 %v308_v40, %v305_v39  ;;  %228 = vst.msk [vmem:[%s1308_s12 + $0x78] sm:$0xff] %vm212_vm0, %v971_v7  ;;  %v309_v46 = vld [vmem:[%s1042_s8 + $0x180] sm:$0xff] }
  0x60   : > { %817 = vmatpush.bf16.msra.mxu3 %v1068_v8  ;;  %528 = vmatmul.bf16.gmra.mxu1 %v340_v47  ;;  %v281_v8 = vld [vmem:[%s1042_s8 + $0xa0] sm:$0xff]  ;;  %229 = vst.msk [vmem:[%s1308_s12 + $0x80] sm:$0xff] %vm212_vm0, %v971_v7  ;;  %v312_v47 = vld [vmem:[%s1042_s8 + $0x198] sm:$0xff] }
  0x61   : > { %597 = vmatmul.bf16.gmra.mxu2 %v341_v48  ;;  %v344_v58 = vpack.c.bf16 %v284_v56, %v281_v8  ;;  %230 = vst.msk [vmem:[%s1308_s12 + $0x88] sm:$0xff] %vm212_vm0, %v971_v7  ;;  %v310_v48 = vld [vmem:[%s1042_s8 + $0x188] sm:$0xff]  ;;  %v368_v8 = vpack.c.bf16 %v332_v50, %v329_v49 }
  0x62   : > { %231 = vst.msk [vmem:[%s1308_s12 + $0x90] sm:$0xff] %vm212_vm0, %v971_v7 }
  0x63   : > { %232 = vst.msk [vmem:[%s1308_s12 + $0x98] sm:$0xff] %vm212_vm0, %v971_v7 }
  0x64   : > { %818 = vmatpush.bf16.msra.mxu3 %v1092_v17  ;;  %v361_v17 = vpack.c.bf16 %v319_v54, %v316_v52  ;;  %233 = vst.msk [vmem:[%s1308_s12 + $0xa0] sm:$0xff] %vm212_vm0, %v971_v7  ;;  %v311_v52 = vld [vmem:[%s1042_s8 + $0x190] sm:$0xff]  ;;  %v314_v54 = vld [vmem:[%s1042_s8 + $0x1a8] sm:$0xff] }
  0x65   : > { %234 = vst.msk [vmem:[%s1308_s12 + $0xa8] sm:$0xff] %vm212_vm0, %v971_v7 }
  0x66   : > { %235 = vst.msk [vmem:[%s1308_s12 + $0xb0] sm:$0xff] %vm212_vm0, %v971_v7 }
  0x67   : > { %236 = vst.msk [vmem:[%s1308_s12 + $0xb8] sm:$0xff] %vm212_vm0, %v971_v7 }
  0x68   : > { %819 = vmatpush.bf16.msra.mxu3 %v1116_v26  ;;  %v343_v26 = vpack.c.bf16 %v283_v55, %v280_v51  ;;  %v313_v51 = vld [vmem:[%s1042_s8 + $0x1a0] sm:$0xff]  ;;  %v357_v55 = vpack.c.bf16 %v312_v47, %v309_v46  ;;  %v243_v46 = vld [vmem:[%s1308_s12 + $0x30] sm:$0xff] }
  0x6c   : > { %820 = vmatpush.bf16.msra.mxu3 %v1140_v35  ;;  %v288_v35 = vld [vmem:[%s1042_s8 + $0xd8] sm:$0xff] }
  0x6f   : > { %464 = vmatmul.bf16.gmra.mxu0 %v342_v57  ;;  %563 = vmatmul.bf16.vlgmr.msrb.gmra.mxu3 %v361_v17  ;;  %v358_v57 = vpack.c.bf16 %v313_v51, %v310_v48  ;;  %v359_v17 = vpack.c.bf16 %v314_v54, %v311_v52 }
  0x70   : > { %821 = vmatpush.bf16.msra.mxu3 %v1164_v44  ;;  %533 = vmatmul.bf16.gmra.mxu1 %v343_v26  ;;  %v287_v44 = vld [vmem:[%s1042_s8 + $0xd0] sm:$0xff] }
  0x71   : > { %602 = vmatmul.bf16.gmra.mxu2 %v344_v58  ;;  %v347_v3 = vpack.c.bf16 %v290_v1, %v287_v44 }
  0x74   : > { %822 = vmatpush.bf16.msra.mxu3 %v1188_v53  ;;  %v345_v53 = vpack.c.bf16 %v288_v35, %v285_v59  ;;  %v237_v35 = vld [vmem:[%s1308_s12] sm:$0xff] }
  0x78   : > { %823 = vmatpush.bf16.msra.mxu3 %v1210_v62  ;;  %v364_v62 = vpack.c.bf16 %v325_v63, %v322_v61 }
  0x7c   : > { %824 = vmatpush.bf16.msra.mxu3 %v1236_v14  ;;  %v348_v14 = vpack.c.bf16 %v294_v5, %v291_v4 }
  0x7f   : > { %469 = vmatmul.bf16.gmra.mxu0 %v345_v53  ;;  %568 = vmatmul.bf16.gmra.mxu3 %v364_v62  ;;  %v238_v62 = vld [vmem:[%s1308_s12 + $0x8] sm:$0xff] }
  0x80   : > { %538 = vmatmul.bf16.gmra.mxu1 %v346_v2 }
  0x81   : > { %607 = vmatmul.bf16.gmra.mxu2 %v347_v3 }
  0x8f   : > { %474 = vmatmul.bf16.gmra.mxu0 %v348_v14  ;;  %573 = vmatmul.bf16.gmra.mxu3 %v367_v15 }
  0x90   : > { %543 = vmatmul.bf16.gmra.mxu1 %v349_v18 }
  0x91   : > { %612 = vmatmul.bf16.gmra.mxu2 %v350_v19 }
  0x9f   : > { %479 = vmatmul.bf16.gmra.mxu0 %v351_v30  ;;  %632 = vmatmul.bf16.vlgmr.msra.gmra.mxu3 %v362_v31  ;;  %v241_v31 = vld [vmem:[%s1308_s12 + $0x20] sm:$0xff] }
  0xa0   : > { %548 = vmatmul.bf16.gmra.mxu1 %v352_v32 }
  0xa1   : > { %617 = vmatmul.bf16.gmra.mxu2 %v353_v33 }
  0xaf   : > { %484 = vmatmul.bf16.gmra.mxu0 %v354_v41  ;;  %637 = vmatmul.bf16.gmra.mxu3 %v365_v42 }
  0xb0   : > { %553 = vmatmul.bf16.gmra.mxu1 %v355_v45 }
  0xb1   : > { %622 = vmatmul.bf16.gmra.mxu2 %v356_v43 }
  0xbc   : > { %v450_v56 = vpop.f32.mrf.mxu0 }
  0xbd   : > { %v519_v26 = vpop.f32.mrf.mxu1 }
  0xbe   : > { %v520_v58 = vadd.f32 %v519_v26, %v450_v56 }
  0xbf   : > { %489 = vmatmul.bf16.gmra.mxu0 %v357_v55  ;;  %642 = vmatmul.bf16.gmra.mxu3 %v368_v8  ;;  %v244_v55 = vld [vmem:[%s1308_s12 + $0x38] sm:$0xff] }
  0xc0   : > { %558 = vmatmul.bf16.gmra.mxu1 %v358_v57 }
  0xc1   : > { %627 = vmatmul.bf16.gmra.mxu2 %v359_v17 }
  0xc2   : > { %v1374_v59 = vpop.f32.mrf.mxu3 }
  0xc4   : > { %v588_v60 = vpop.f32.mrf.mxu2  ;;  %v452_v63 = vpop.f32.mrf.mxu0 }
  0xc5   : > { %v589_v61 = vadd.f32 %v588_v60, %v520_v58  ;;  %v521_v0 = vpop.f32.mrf.mxu1  ;;  %v245_v60 = vld [vmem:[%s1308_s12 + $0x40] sm:$0xff] }
  0xc6   : > { %v522_v1 = vadd.f32 %v521_v0, %v452_v63 }
  0xc7   : > { %v648_v44 = vadd.f32 %v589_v61, %v237_v35 }
  0xc9   : > { %673 = vst.msk [vmem:[%s1308_s12] sm:$0xff] %vm212_vm0, %v648_v44 }
  0xca   : > { %v1379_v53 = vpop.f32.mrf.mxu3 }
  0xcc   : > { %v590_v2 = vpop.f32.mrf.mxu2  ;;  %v455_v4 = vpop.f32.mrf.mxu0 }
  0xcd   : > { %v591_v3 = vadd.f32 %v590_v2, %v522_v1  ;;  %v524_v5 = vpop.f32.mrf.mxu1 }
  0xce   : > { %v525_v9 = vadd.f32 %v524_v5, %v455_v4 }
  0xcf   : > { %v649_v6 = vadd.f32 %v591_v3, %v238_v62  ;;  %v246_v3 = vld [vmem:[%s1308_s12 + $0x48] sm:$0xff] }
  0xd1   : > { %674 = vst.msk [vmem:[%s1308_s12 + $0x8] sm:$0xff] %vm212_vm0, %v649_v6 }
  0xd2   : > { %v1384_v10 = vpop.f32.mrf.mxu3 }
  0xd4   : > { %v593_v12 = vpop.f32.mrf.mxu2  ;;  %v457_v14 = vpop.f32.mrf.mxu0 }
  0xd5   : > { %v594_v13 = vadd.f32 %v593_v12, %v525_v9  ;;  %v526_v15 = vpop.f32.mrf.mxu1 }
  0xd6   : > { %v527_v19 = vadd.f32 %v526_v15, %v457_v14  ;;  %v247_v14 = vld [vmem:[%s1308_s12 + $0x50] sm:$0xff] }
  0xd7   : > { %v650_v18 = vadd.f32 %v594_v13, %v239_v11 }
  0xd9   : > { %675 = vst.msk [vmem:[%s1308_s12 + $0x10] sm:$0xff] %vm212_vm0, %v650_v18 }
  0xda   : > { %v1389_v20 = vpop.f32.mrf.mxu3 }
  0xdc   : > { %v595_v22 = vpop.f32.mrf.mxu2  ;;  %v460_v24 = vpop.f32.mrf.mxu0 }
  0xdd   : > { %v596_v23 = vadd.f32 %v595_v22, %v527_v19  ;;  %v529_v27 = vpop.f32.mrf.mxu1 }
  0xde   : > { %v530_v29 = vadd.f32 %v529_v27, %v460_v24  ;;  %v248_v27 = vld [vmem:[%s1308_s12 + $0x58] sm:$0xff] }
  0xdf   : > { %v651_v28 = vadd.f32 %v596_v23, %v240_v21 }
  0xe1   : > { %676 = vst.msk [vmem:[%s1308_s12 + $0x18] sm:$0xff] %vm212_vm0, %v651_v28 }
  0xe2   : > { %v1394_v30 = vpop.f32.mrf.mxu3 }
  0xe4   : > { %v598_v32 = vpop.f32.mrf.mxu2  ;;  %v462_v7 = vpop.f32.mrf.mxu0 }
  0xe5   : > { %v599_v33 = vadd.f32 %v598_v32, %v530_v29  ;;  %v531_v16 = vpop.f32.mrf.mxu1 }
  0xe6   : > { %v532_v36 = vadd.f32 %v531_v16, %v462_v7 }
  0xe7   : > { %v652_v25 = vadd.f32 %v599_v33, %v241_v31 }
  0xe9   : > { %677 = vst.msk [vmem:[%s1308_s12 + $0x20] sm:$0xff] %vm212_vm0, %v652_v25  ;;  %v255_v25 = vld [vmem:[%s1308_s12 + $0x90] sm:$0xff] }
  0xea   : > { %v1399_v37 = vpop.f32.mrf.mxu3 }
  0xec   : > { %v600_v34 = vpop.f32.mrf.mxu2  ;;  %v465_v40 = vpop.f32.mrf.mxu0 }
  0xed   : > { %v601_v39 = vadd.f32 %v600_v34, %v532_v36  ;;  %v534_v41 = vpop.f32.mrf.mxu1 }
  0xee   : > { %v535_v45 = vadd.f32 %v534_v41, %v465_v40 }
  0xef   : > { %v653_v42 = vadd.f32 %v601_v39, %v242_v38  ;;  %v249_v38 = vld [vmem:[%s1308_s12 + $0x60] sm:$0xff] }
  0xf1   : > { %678 = vst.msk [vmem:[%s1308_s12 + $0x28] sm:$0xff] %vm212_vm0, %v653_v42 }
  0xf2   : > { %v564_v43 = vpop.f32.mrf.mxu3 }
  0xf3   : > { %v565_v16 = vadd.f32 %v564_v43, %v1374_v59  ;;  %v256_v43 = vld [vmem:[%s1308_s12 + $0x98] sm:$0xff] }
  0xf4   : > { %v603_v47 = vpop.f32.mrf.mxu2  ;;  %v467_v49 = vpop.f32.mrf.mxu0 }
  0xf5   : > { %v604_v48 = vadd.f32 %v603_v47, %v535_v45  ;;  %v536_v50 = vpop.f32.mrf.mxu1 }
  0xf6   : > { %v537_v52 = vadd.f32 %v536_v50, %v467_v49  ;;  %v250_v49 = vld [vmem:[%s1308_s12 + $0x68] sm:$0xff] }
  0xf7   : > { %v654_v51 = vadd.f32 %v604_v48, %v243_v46 }
  0xf9   : > { %679 = vst.msk [vmem:[%s1308_s12 + $0x30] sm:$0xff] %vm212_vm0, %v654_v51 }
  0xfa   : > { %v566_v54 = vpop.f32.mrf.mxu3 }
  0xfb   : > { %v567_v47 = vadd.f32 %v566_v54, %v1379_v53 }
  0xfc   : > { %v605_v8 = vpop.f32.mrf.mxu2  ;;  %v470_v57 = vpop.f32.mrf.mxu0 }
  0xfd   : > { %v606_v56 = vadd.f32 %v605_v8, %v537_v52  ;;  %v539_v17 = vpop.f32.mrf.mxu1 }
  0xfe   : > { %v540_v58 = vadd.f32 %v539_v17, %v470_v57  ;;  %v257_v17 = vld [vmem:[%s1308_s12 + $0xa0] sm:$0xff] }
  0xff   : > { %v655_v26 = vadd.f32 %v606_v56, %v244_v55 }
 0x101   : > { %680 = vst.msk [vmem:[%s1308_s12 + $0x38] sm:$0xff] %vm212_vm0, %v655_v26 }
 0x102   : > { %v1410_v35 = vpop.f32.mrf.mxu3 }
 0x103   : > { %v570_v54 = vadd.f32 %v1410_v35, %v1384_v10 }
 0x104   : > { %v608_v61 = vpop.f32.mrf.mxu2  ;;  %v472_v0 = vpop.f32.mrf.mxu0 }
 0x105   : > { %v609_v63 = vadd.f32 %v608_v61, %v540_v58  ;;  %v541_v44 = vpop.f32.mrf.mxu1  ;;  %v251_v58 = vld [vmem:[%s1308_s12 + $0x70] sm:$0xff] }
 0x106   : > { %v542_v62 = vadd.f32 %v541_v44, %v472_v0 }
 0x107   : > { %v656_v1 = vadd.f32 %v609_v63, %v245_v60 }
 0x109   : > { %681 = vst.msk [vmem:[%s1308_s12 + $0x40] sm:$0xff] %vm212_vm0, %v656_v1 }
 0x10a   : > { %v1415_v2 = vpop.f32.mrf.mxu3 }
 0x10b   : > { %v572_v10 = vadd.f32 %v1415_v2, %v1389_v20 }
 0x10c   : > { %v610_v4 = vpop.f32.mrf.mxu2  ;;  %v475_v6 = vpop.f32.mrf.mxu0 }
 0x10d   : > { %v611_v5 = vadd.f32 %v610_v4, %v542_v62  ;;  %v544_v9 = vpop.f32.mrf.mxu1 }
 0x10e   : > { %v545_v12 = vadd.f32 %v544_v9, %v475_v6 }
 0x10f   : > { %v657_v11 = vadd.f32 %v611_v5, %v246_v3  ;;  %v258_v3 = vld [vmem:[%s1308_s12 + $0xa8] sm:$0xff]  ;;  %v252_v5 = vld [vmem:[%s1308_s12 + $0x78] sm:$0xff] }
 0x111   : > { %682 = vst.msk [vmem:[%s1308_s12 + $0x48] sm:$0xff] %vm212_vm0, %v657_v11 }
 0x112   : > { %v1420_v13 = vpop.f32.mrf.mxu3 }
 0x113   : > { %v575_v2 = vadd.f32 %v1420_v13, %v1394_v30 }
 0x114   : > { %v613_v15 = vpop.f32.mrf.mxu2  ;;  %v477_v19 = vpop.f32.mrf.mxu0 }
 0x115   : > { %v614_v18 = vadd.f32 %v613_v15, %v545_v12  ;;  %v546_v21 = vpop.f32.mrf.mxu1 }
 0x116   : > { %v547_v23 = vadd.f32 %v546_v21, %v477_v19  ;;  %v259_v19 = vld [vmem:[%s1308_s12 + $0xb0] sm:$0xff] }
 0x117   : > { %v658_v22 = vadd.f32 %v614_v18, %v247_v14 }
 0x119   : > { %683 = vst.msk [vmem:[%s1308_s12 + $0x50] sm:$0xff] %vm212_vm0, %v658_v22  ;;  %v253_v22 = vld [vmem:[%s1308_s12 + $0x80] sm:$0xff] }
 0x11a   : > { %v1425_v24 = vpop.f32.mrf.mxu3 }
 0x11b   : > { %v577_v30 = vadd.f32 %v1425_v24, %v1399_v37 }
 0x11c   : > { %v615_v28 = vpop.f32.mrf.mxu2  ;;  %v480_v31 = vpop.f32.mrf.mxu0 }
 0x11d   : > { %v616_v29 = vadd.f32 %v615_v28, %v547_v23  ;;  %v549_v32 = vpop.f32.mrf.mxu1 }
 0x11e   : > { %v550_v7 = vadd.f32 %v549_v32, %v480_v31 }
 0x11f   : > { %v659_v33 = vadd.f32 %v616_v29, %v248_v27 }
 0x121   : > { %684 = vst.msk [vmem:[%s1308_s12 + $0x58] sm:$0xff] %vm212_vm0, %v659_v33 }
 0x122   : > { %v633_v36 = vpop.f32.mrf.mxu3 }
 0x123   : > { %v634_v39 = vadd.f32 %v633_v36, %v565_v16 }
 0x124   : > { %v618_v34 = vpop.f32.mrf.mxu2  ;;  %v482_v41 = vpop.f32.mrf.mxu0 }
 0x125   : > { %v619_v40 = vadd.f32 %v618_v34, %v550_v7  ;;  %v666_v42 = vadd.f32 %v634_v39, %v255_v25  ;;  %v551_v45 = vpop.f32.mrf.mxu1  ;;  %v260_v7 = vld [vmem:[%s1308_s12 + $0xb8] sm:$0xff]  ;;  %v254_v25 = vld [vmem:[%s1308_s12 + $0x88] sm:$0xff] }
 0x126   : > { %v552_v59 = vadd.f32 %v551_v45, %v482_v41 }
 0x127   : > { %v660_v46 = vadd.f32 %v619_v40, %v249_v38  ;;  %691 = vst.msk [vmem:[%s1308_s12 + $0x90] sm:$0xff] %vm212_vm0, %v666_v42 }
 0x129   : > { %685 = vst.msk [vmem:[%s1308_s12 + $0x60] sm:$0xff] %vm212_vm0, %v660_v46 }
 0x12a   : > { %v635_v48 = vpop.f32.mrf.mxu3 }
 0x12b   : > { %v636_v51 = vadd.f32 %v635_v48, %v567_v47 }
 0x12c   : > { %v620_v50 = vpop.f32.mrf.mxu2  ;;  %v485_v55 = vpop.f32.mrf.mxu0 }
 0x12d   : > { %v621_v52 = vadd.f32 %v620_v50, %v552_v59  ;;  %v667_v8 = vadd.f32 %v636_v51, %v256_v43  ;;  %v554_v56 = vpop.f32.mrf.mxu1 }
 0x12e   : > { %v555_v53 = vadd.f32 %v554_v56, %v485_v55 }
 0x12f   : > { %v661_v57 = vadd.f32 %v621_v52, %v250_v49  ;;  %692 = vst.msk [vmem:[%s1308_s12 + $0x98] sm:$0xff] %vm212_vm0, %v667_v8 }
 0x131   : > { %686 = vst.msk [vmem:[%s1308_s12 + $0x68] sm:$0xff] %vm212_vm0, %v661_v57 }
 0x132   : > { %v638_v26 = vpop.f32.mrf.mxu3 }
 0x133   : > { %v639_v61 = vadd.f32 %v638_v26, %v570_v54 }
 0x134   : > { %v623_v60 = vpop.f32.mrf.mxu2  ;;  %v487_v0 = vpop.f32.mrf.mxu0 }
 0x135   : > { %v624_v63 = vadd.f32 %v623_v60, %v555_v53  ;;  %v668_v44 = vadd.f32 %v639_v61, %v257_v17  ;;  %v556_v1 = vpop.f32.mrf.mxu1 }
 0x136   : > { %v557_v35 = vadd.f32 %v556_v1, %v487_v0 }
 0x137   : > { %v662_v62 = vadd.f32 %v624_v63, %v251_v58  ;;  %693 = vst.msk [vmem:[%s1308_s12 + $0xa0] sm:$0xff] %vm212_vm0, %v668_v44 }
 0x139   : > { %687 = vst.msk [vmem:[%s1308_s12 + $0x70] sm:$0xff] %vm212_vm0, %v662_v62 }
 0x13a   : > { %v640_v4 = vpop.f32.mrf.mxu3 }
 0x13b   : > { %v641_v9 = vadd.f32 %v640_v4, %v572_v10 }
 0x13c   : > { %v625_v6 = vpop.f32.mrf.mxu2  ;;  %v490_v14 = vpop.f32.mrf.mxu0 }
 0x13d   : > { %v626_v11 = vadd.f32 %v625_v6, %v557_v35  ;;  %v669_v12 = vadd.f32 %v641_v9, %v258_v3  ;;  %v559_v15 = vpop.f32.mrf.mxu1 }
 0x13e   : > { %v560_v20 = vadd.f32 %v559_v15, %v490_v14 }
 0x13f   : > { %v663_v18 = vadd.f32 %v626_v11, %v252_v5  ;;  %694 = vst.msk [vmem:[%s1308_s12 + $0xa8] sm:$0xff] %vm212_vm0, %v669_v12 }
 0x141   : > { %688 = vst.msk [vmem:[%s1308_s12 + $0x78] sm:$0xff] %vm212_vm0, %v663_v18 }
 0x142   : > { %v643_v21 = vpop.f32.mrf.mxu3 }
 0x143   : > { %v644_v27 = vadd.f32 %v643_v21, %v575_v2 }
 0x144   : > { %v628_v23 = vpop.f32.mrf.mxu2  ;;  %v492_v32 = vpop.f32.mrf.mxu0 }
 0x145   : > { %v629_v28 = vadd.f32 %v628_v23, %v560_v20  ;;  %v670_v29 = vadd.f32 %v644_v27, %v259_v19  ;;  %v561_v33 = vpop.f32.mrf.mxu1 }
 0x146   : > { %v562_v13 = vadd.f32 %v561_v33, %v492_v32 }
 0x147   : > { %v664_v31 = vadd.f32 %v629_v28, %v253_v22  ;;  %695 = vst.msk [vmem:[%s1308_s12 + $0xb0] sm:$0xff] %vm212_vm0, %v670_v29 }
 0x149   : > { %689 = vst.msk [vmem:[%s1308_s12 + $0x80] sm:$0xff] %vm212_vm0, %v664_v31 }
 0x14a   : > { %v645_v16 = vpop.f32.mrf.mxu3 }
 0x14b   : > { %v646_v38 = vadd.f32 %v645_v16, %v577_v30 }
 0x14c   : > { %v630_v36 = vpop.f32.mrf.mxu2 }
 0x14d   : > { %v631_v34 = vadd.f32 %v630_v36, %v562_v13  ;;  %v671_v39 = vadd.f32 %v646_v38, %v260_v7 }
 0x14f   : > { %v665_v40 = vadd.f32 %v631_v34, %v254_v25  ;;  %696 = vst.msk [vmem:[%s1308_s12 + $0xb8] sm:$0xff] %vm212_vm0, %v671_v39 }
 0x151   : > { %690 = vst.msk [vmem:[%s1308_s12 + $0x88] sm:$0xff] %vm212_vm0, %v665_v40 }
 0x152 PF: > { %s15_s14 = sadd.s32 1, %s967_s14   ;;  %s1498_s9 = smov %s951_s10 }
 0x153   : > { %p12_p0 = scmp.ge.s32.totalorder %s15_s14, 4   ;;  %s1499_s10 = smov %s955_s11 }
 0x154   : > { %s1500_s11 = smov %s1032_s20  ;;  %s1501_s12 = smov %s963_s13 }
 0x155   : > { %s1502_s13 = smov %s1504_s16  ;;  %14 = sbr.rel (!%p12_p0) target bundleno = 4 (0x4), region = 75 }
 0x15a   :  { %719 = vsyncpa [#allocation3], 1 }
 0x15b   :  { %721 = vsyncpa [#allocation3 + $0x1], 1 }

</bundles_post_ra>
